<compile_context>
chip_gen: v7x
topology: tpu7x:2x2x1
jax: 0.10.0
libtpu: 0.0.40
codegen_flags: <defaults>
</compile_context>

<pallas_src>
import jax
import jax.numpy as jnp
from jax import lax
from jax.experimental import pallas as pl
from jax.experimental.pallas import tpu as pltpu


_VMEM_SPEC = pl.BlockSpec(memory_space=pltpu.MemorySpace.VMEM)


# ----------------------------- fused Pallas kernel ------------------------------

def fused_weighting_kernel(emb_ref, emb_flat_ref, w1_ref, wi_ref, slab_ref,
                           losses_ref, out_ref):
    """Single grid-less invocation; everything lives in VMEM.

    Inputs:
      emb_ref      (T, D)      task embeddings
      emb_flat_ref (1, T*D)    same data, flattened (free reshape in the wrapper)
      w1_ref       (D, Hp)     attention Linear(D,100) weight, hidden padded 100->128
      wi_ref       (T*D, D)    Interact_attention Linear(T*D, D) weight
      slab_ref     (4, Hp)     row0=b1 (padded), row1=w2 row (padded), row2[0]=b2, row3[:D]=bi
      losses_ref   (T, 1)      per-task query losses (column layout)
    Output:
      out_ref      (T, 4)      col0 = similarity softmax weights, col1 = interact softmax
                               weights, col2 = similarity loss_q (broadcast), col3 = interact
                               loss_q (broadcast)
    """
    emb = emb_ref[...]                       # (T, D)
    losses = losses_ref[...]                 # (T, 1)
    T, D = emb.shape
    inv_T = jnp.float32(1.0 / T)

    b1 = slab_ref[0:1, :]                    # (1, Hp)   padded entries are exactly zero
    w2row = slab_ref[1:2, :]                 # (1, Hp)   padded entries are exactly zero
    b2 = slab_ref[2:3, 0:1]                  # (1, 1)
    bi = slab_ref[3:4, 0:D]                  # (1, D)

    # ------------------- add_similarity branch: attention(dim) -------------------
    # Linear(D, Hp) + ReLU  (padding stays zero through bias add + ReLU).
    h = jnp.dot(emb, w1_ref[...], preferred_element_type=jnp.float32) + b1     # (T, Hp)
    h = jnp.maximum(h, 0.0)
    # Linear(Hp, 1) as a VPU broadcast-mul + lane reduction (no N=1 MXU pass).
    s = jnp.sum(h * w2row, axis=1, keepdims=True) + b2                         # (T, 1)
    # softmax over the task axis in (T,1) column layout (== softmax(dim=1) of s.T); exact.
    m = jnp.max(s, axis=0, keepdims=True)
    e = jnp.exp(s - m)
    w_sim = e / jnp.sum(e, axis=0, keepdims=True)                              # (T, 1)
    sim_loss = jnp.sum(w_sim * losses, axis=0, keepdims=True) * inv_T          # (1, 1)

    # ------------------- interact branch: Interact_attention ---------------------
    rep = jnp.tanh(jnp.dot(emb_flat_ref[...], wi_ref[...],
                           preferred_element_type=jnp.float32) + bi)           # (1, D)
    # Full-vector L2 normalize (PyTorch rep is 1-D, so F.normalize(dim=0) == /||rep||).
    rep_n = rep * lax.rsqrt(jnp.maximum(
        jnp.sum(rep * rep, axis=1, keepdims=True), 1e-24))                     # (1, D)
    # Row-wise L2 normalize of the task embeddings.
    emb_n = emb * lax.rsqrt(jnp.maximum(
        jnp.sum(emb * emb, axis=1, keepdims=True), 1e-24))                     # (T, D)
    # emb_n @ rep_n.T as a VPU broadcast-mul + lane reduction (no transpose, no MXU pass).
    tw = jnp.sum(emb_n * rep_n, axis=1, keepdims=True)                         # (T, 1)
    m2 = jnp.max(tw, axis=0, keepdims=True)                                    # softmax(dim=0)
    e2 = jnp.exp(tw - m2)
    w_int = e2 / jnp.sum(e2, axis=0, keepdims=True)                            # (T, 1)
    int_loss = jnp.sum(w_int * losses, axis=0, keepdims=True) * inv_T          # (1, 1)

    # ------------- pack everything into one output slab (single writeback) -------------
    lane = lax.broadcasted_iota(jnp.int32, (T, 4), 1)
    out_ref[...] = jnp.where(lane == 0, w_sim,
                   jnp.where(lane == 1, w_int,
                   jnp.where(lane == 2, sim_loss, int_loss)))


# ------------------------- one-time parameter packing ---------------------------

def prepare_params(w1, b1, w2, b2, wi, bi):
    """Init-time padding/packing (hoisted out of the per-call hot path).

    Returns (w1p, wi, slab):
      w1p  (D, 128)   hidden dim zero-padded 100 -> 128 (padding neutral through ReLU/reduce)
      wi   (T*D, D)   Interact_attention weight, float32
      slab (4, 128)   row0 = b1 padded, row1 = w2 row padded, row2[0] = b2, row3[:D] = bi
    """
    D, H = w1.shape
    Hp = 128 * ((H + 127) // 128)
    Di = bi.size
    assert Hp == 128 and Di <= 128, "param slab layout assumes H <= 128 and emb_dim <= 128"

    w1p = jnp.zeros((D, Hp), jnp.float32).at[:, :H].set(w1.astype(jnp.float32))
    slab = jnp.zeros((4, Hp), jnp.float32)
    slab = slab.at[0, :H].set(b1.reshape(H).astype(jnp.float32))
    slab = slab.at[1, :H].set(w2.reshape(H).astype(jnp.float32))
    slab = slab.at[2, 0].set(jnp.asarray(b2, jnp.float32).reshape(()))
    slab = slab.at[3, :Di].set(bi.reshape(Di).astype(jnp.float32))
    return w1p, wi.astype(jnp.float32), slab


# ------------------------------- hot-path wrapper -----------------------------------

@jax.jit
def meta_task_weighting(tasks_emb, losses_q, w1p, wi, slab):
    """Returns a packed (T, 4) slab:
         [:, 0] similarity softmax weights        [:, 1] interact softmax weights
         [0, 2] similarity loss_q                 [0, 3] interact loss_q
    Only free contiguous reshapes happen per call; all padding is pre-done in prepare_params.
    """
    T, D = tasks_emb.shape
    emb_flat = tasks_emb.reshape(1, T * D)     # free bitcast of contiguous data
    losses_col = losses_q.reshape(T, 1)        # free bitcast of contiguous data

    return pl.pallas_call(
        fused_weighting_kernel,
        out_shape=jax.ShapeDtypeStruct((T, 4), jnp.float32),
        in_specs=[_VMEM_SPEC] * 6,
        out_specs=_VMEM_SPEC,
    )(tasks_emb, emb_flat, w1p, wi, slab, losses_col)


# ---------------------------- pure-JAX references ----------------------------

def _ref_similarity(tasks_emb, w1, b1, w2, b2, losses_q):
    h = jnp.maximum(tasks_emb @ w1 + b1, 0.0)
    s = h @ w2 + b2                     # (T,1)
    w = jax.nn.softmax(s.T, axis=1)     # (1,T)
    return w, jnp.sum(w * losses_q) / tasks_emb.shape[0]


def _ref_interact(tasks_emb, wi, bi, losses_q):
    T, D = tasks_emb.shape
    rep = jnp.tanh(tasks_emb.reshape(1, T * D) @ wi + bi)
    rep = rep / jnp.maximum(jnp.linalg.norm(rep), 1e-12)
    emb_n = tasks_emb / jnp.maximum(
        jnp.linalg.norm(tasks_emb, axis=1, keepdims=True), 1e-12)
    tw = emb_n @ rep.T                  # (T,1)
    sm = jax.nn.softmax(tw, axis=0).T   # (1,T)
    return sm, jnp.sum(losses_q * sm) / T


# ----------------------------------- main ------------------------------------

if __name__ == "__main__":
    # Small synthetic sizes consistent with the module:
    #   num_train_tasks T = 8, emb_dim D = 32, attention hidden H = 100 (fixed in module).
    T, D, H = 8, 32, 100
    key = jax.random.PRNGKey(0)
    k = jax.random.split(key, 8)

    # task embeddings (produced upstream by the GNN in the original model) and query losses
    tasks_emb = jax.random.normal(k[0], (T, D), dtype=jnp.float32)
    losses_q = jax.random.uniform(k[1], (1, T), dtype=jnp.float32)

    # attention(dim) params: Linear(D,100) -> ReLU -> Linear(100,1), stored (in, out)
    lim1 = 1.0 / jnp.sqrt(D)
    w1 = jax.random.uniform(k[2], (D, H), jnp.float32, -lim1, lim1)
    b1 = jax.random.uniform(k[3], (1, H), jnp.float32, -lim1, lim1)
    lim2 = 1.0 / jnp.sqrt(H)
    w2 = jax.random.uniform(k[4], (H, 1), jnp.float32, -lim2, lim2)
    b2 = jax.random.uniform(k[5], (1, 1), jnp.float32, -lim2, lim2)

    # Interact_attention(dim, num_tasks) params: Linear(T*D, D) -> Tanh, stored (in, out)
    limi = 1.0 / jnp.sqrt(T * D)
    wi = jax.random.uniform(k[6], (T * D, D), jnp.float32, -limi, limi)
    bi = jax.random.uniform(k[7], (1, D), jnp.float32, -limi, limi)

    # One-time parameter packing (outside the per-call hot path).
    w1p, wi_p, slab = prepare_params(w1, b1, w2, b2, wi, bi)

    packed = meta_task_weighting(tasks_emb, losses_q, w1p, wi_p, slab)
    jax.block_until_ready(packed)

    sim_w = packed[:, 0].reshape(1, T)
    int_w = packed[:, 1].reshape(1, T)
    sim_loss = packed[0, 2]
    int_loss = packed[0, 3]

    ref_w, ref_loss = _ref_similarity(tasks_emb, w1, b1, w2, b2, losses_q)
    ref_w2, ref_loss2 = _ref_interact(tasks_emb, wi, bi, losses_q)

    # Exact softmax normalization: weights must sum to 1 to f32 roundoff.
    assert abs(float(jnp.sum(packed[:, 0])) - 1.0) < 1e-5
    assert abs(float(jnp.sum(packed[:, 1])) - 1.0) < 1e-5

    # Tolerances dominated by MXU f32 dot precision / EUP rsqrt, not the softmax anymore.
    assert jnp.allclose(sim_w, ref_w, atol=2e-3, rtol=2e-3)
    assert jnp.allclose(sim_loss, ref_loss, atol=2e-3, rtol=2e-3)
    assert jnp.allclose(int_w, ref_w2, atol=2e-3, rtol=2e-3)
    assert jnp.allclose(int_loss, ref_loss2, atol=2e-3, rtol=2e-3)

    print("KERNEL_OK")
</pallas_src>

<mosaic_0001>
module attributes {stable_mosaic.version = 11 : i64} {
  func.func @fused_weighting_kernel(%arg0: memref<8x32xf32, #tpu.memory_space<vmem>>, %arg1: memref<1x256xf32, #tpu.memory_space<vmem>>, %arg2: memref<32x128xf32, #tpu.memory_space<vmem>>, %arg3: memref<256x32xf32, #tpu.memory_space<vmem>>, %arg4: memref<4x128xf32, #tpu.memory_space<vmem>>, %arg5: memref<8x1xf32, #tpu.memory_space<vmem>>, %arg6: memref<8x4xf32, #tpu.memory_space<vmem>>) attributes {dimension_semantics = [], scalar_prefetch = 0 : i64, scratch_operands = 0 : i64, tpu.core_type = #tpu.core_type<tc>} {
    %c0 = arith.constant 0 : index
    %c0_0 = arith.constant 0 : index
    %0 = vector.load %arg0[%c0, %c0_0] : memref<8x32xf32, #tpu.memory_space<vmem>>, vector<8x32xf32>
    %c0_1 = arith.constant 0 : index
    %c0_2 = arith.constant 0 : index
    %1 = vector.load %arg5[%c0_1, %c0_2] : memref<8x1xf32, #tpu.memory_space<vmem>>, vector<8x1xf32>
    %c0_3 = arith.constant 0 : index
    %c0_4 = arith.constant 0 : index
    %2 = vector.load %arg4[%c0_3, %c0_4] : memref<4x128xf32, #tpu.memory_space<vmem>>, vector<1x128xf32>
    %c1 = arith.constant 1 : index
    %c0_5 = arith.constant 0 : index
    %3 = vector.load %arg4[%c1, %c0_5] : memref<4x128xf32, #tpu.memory_space<vmem>>, vector<1x128xf32>
    %c2 = arith.constant 2 : index
    %c0_6 = arith.constant 0 : index
    %4 = vector.load %arg4[%c2, %c0_6] : memref<4x128xf32, #tpu.memory_space<vmem>>, vector<1x1xf32>
    %c3 = arith.constant 3 : index
    %c0_7 = arith.constant 0 : index
    %5 = vector.load %arg4[%c3, %c0_7] : memref<4x128xf32, #tpu.memory_space<vmem>>, vector<1x32xf32>
    %c0_8 = arith.constant 0 : index
    %c0_9 = arith.constant 0 : index
    %6 = vector.load %arg2[%c0_8, %c0_9] : memref<32x128xf32, #tpu.memory_space<vmem>>, vector<32x128xf32>
    %cst = arith.constant dense<0.000000e+00> : vector<8x128xf32>
    %7 = tpu.matmul %0, %6, %cst {dimension_numbers = #tpu.dot_dimension_numbers<[1], [0], [0], [1], [0, 0, 1, 1], [], []>} : vector<8x32xf32>, vector<32x128xf32>, vector<8x128xf32> -> vector<8x128xf32>
    %8 = vector.broadcast %2 : vector<1x128xf32> to vector<8x128xf32>
    %9 = arith.addf %7, %8 : vector<8x128xf32>
    %cst_10 = arith.constant 0.000000e+00 : f32
    %10 = vector.broadcast %cst_10 : f32 to vector<8x128xf32>
    %11 = arith.maximumf %9, %10 : vector<8x128xf32>
    %12 = vector.broadcast %3 : vector<1x128xf32> to vector<8x128xf32>
    %13 = arith.mulf %11, %12 : vector<8x128xf32>
    %cst_11 = arith.constant dense<0.000000e+00> : vector<8xf32>
    %14 = vector.multi_reduction <add>, %13, %cst_11 [1] : vector<8x128xf32> to vector<8xf32>
    %15 = vector.shape_cast %14 : vector<8xf32> to vector<8x1xf32>
    %16 = vector.broadcast %4 : vector<1x1xf32> to vector<8x1xf32>
    %17 = arith.addf %15, %16 : vector<8x1xf32>
    %cst_12 = arith.constant dense<0xFF800000> : vector<1xf32>
    %18 = vector.multi_reduction <maximumf>, %17, %cst_12 [0] : vector<8x1xf32> to vector<1xf32>
    %19 = vector.shape_cast %18 : vector<1xf32> to vector<1x1xf32>
    %20 = vector.broadcast %19 : vector<1x1xf32> to vector<8x1xf32>
    %21 = arith.subf %17, %20 : vector<8x1xf32>
    %22 = math.exp %21 : vector<8x1xf32>
    %cst_13 = arith.constant dense<0.000000e+00> : vector<1xf32>
    %23 = vector.multi_reduction <add>, %22, %cst_13 [0] : vector<8x1xf32> to vector<1xf32>
    %24 = vector.shape_cast %23 : vector<1xf32> to vector<1x1xf32>
    %25 = vector.broadcast %24 : vector<1x1xf32> to vector<8x1xf32>
    %26 = arith.divf %22, %25 : vector<8x1xf32>
    %27 = arith.mulf %26, %1 : vector<8x1xf32>
    %cst_14 = arith.constant dense<0.000000e+00> : vector<1xf32>
    %28 = vector.multi_reduction <add>, %27, %cst_14 [0] : vector<8x1xf32> to vector<1xf32>
    %29 = vector.shape_cast %28 : vector<1xf32> to vector<1x1xf32>
    %cst_15 = arith.constant 1.250000e-01 : f32
    %30 = vector.broadcast %cst_15 : f32 to vector<1x1xf32>
    %31 = arith.mulf %29, %30 : vector<1x1xf32>
    %c0_16 = arith.constant 0 : index
    %c0_17 = arith.constant 0 : index
    %32 = vector.load %arg1[%c0_16, %c0_17] : memref<1x256xf32, #tpu.memory_space<vmem>>, vector<1x256xf32>
    %c0_18 = arith.constant 0 : index
    %c0_19 = arith.constant 0 : index
    %33 = vector.load %arg3[%c0_18, %c0_19] : memref<256x32xf32, #tpu.memory_space<vmem>>, vector<256x32xf32>
    %cst_20 = arith.constant dense<0.000000e+00> : vector<1x32xf32>
    %34 = tpu.matmul %32, %33, %cst_20 {dimension_numbers = #tpu.dot_dimension_numbers<[1], [0], [0], [1], [0, 0, 1, 1], [], []>} : vector<1x256xf32>, vector<256x32xf32>, vector<1x32xf32> -> vector<1x32xf32>
    %35 = arith.addf %34, %5 : vector<1x32xf32>
    %36 = math.tanh %35 : vector<1x32xf32>
    %37 = arith.mulf %36, %36 : vector<1x32xf32>
    %cst_21 = arith.constant dense<0.000000e+00> : vector<1xf32>
    %38 = vector.multi_reduction <add>, %37, %cst_21 [1] : vector<1x32xf32> to vector<1xf32>
    %39 = vector.shape_cast %38 : vector<1xf32> to vector<1x1xf32>
    %cst_22 = arith.constant 1.000000e-24 : f32
    %40 = vector.broadcast %cst_22 : f32 to vector<1x1xf32>
    %41 = arith.maximumf %39, %40 : vector<1x1xf32>
    %42 = math.rsqrt %41 : vector<1x1xf32>
    %43 = vector.broadcast %42 : vector<1x1xf32> to vector<1x32xf32>
    %44 = arith.mulf %36, %43 : vector<1x32xf32>
    %45 = arith.mulf %0, %0 : vector<8x32xf32>
    %cst_23 = arith.constant dense<0.000000e+00> : vector<8xf32>
    %46 = vector.multi_reduction <add>, %45, %cst_23 [1] : vector<8x32xf32> to vector<8xf32>
    %47 = vector.shape_cast %46 : vector<8xf32> to vector<8x1xf32>
    %cst_24 = arith.constant 1.000000e-24 : f32
    %48 = vector.broadcast %cst_24 : f32 to vector<8x1xf32>
    %49 = arith.maximumf %47, %48 : vector<8x1xf32>
    %50 = math.rsqrt %49 : vector<8x1xf32>
    %51 = vector.broadcast %50 : vector<8x1xf32> to vector<8x32xf32>
    %52 = arith.mulf %0, %51 : vector<8x32xf32>
    %53 = vector.broadcast %44 : vector<1x32xf32> to vector<8x32xf32>
    %54 = arith.mulf %52, %53 : vector<8x32xf32>
    %cst_25 = arith.constant dense<0.000000e+00> : vector<8xf32>
    %55 = vector.multi_reduction <add>, %54, %cst_25 [1] : vector<8x32xf32> to vector<8xf32>
    %56 = vector.shape_cast %55 : vector<8xf32> to vector<8x1xf32>
    %cst_26 = arith.constant dense<0xFF800000> : vector<1xf32>
    %57 = vector.multi_reduction <maximumf>, %56, %cst_26 [0] : vector<8x1xf32> to vector<1xf32>
    %58 = vector.shape_cast %57 : vector<1xf32> to vector<1x1xf32>
    %59 = vector.broadcast %58 : vector<1x1xf32> to vector<8x1xf32>
    %60 = arith.subf %56, %59 : vector<8x1xf32>
    %61 = math.exp %60 : vector<8x1xf32>
    %cst_27 = arith.constant dense<0.000000e+00> : vector<1xf32>
    %62 = vector.multi_reduction <add>, %61, %cst_27 [0] : vector<8x1xf32> to vector<1xf32>
    %63 = vector.shape_cast %62 : vector<1xf32> to vector<1x1xf32>
    %64 = vector.broadcast %63 : vector<1x1xf32> to vector<8x1xf32>
    %65 = arith.divf %61, %64 : vector<8x1xf32>
    %66 = arith.mulf %65, %1 : vector<8x1xf32>
    %cst_28 = arith.constant dense<0.000000e+00> : vector<1xf32>
    %67 = vector.multi_reduction <add>, %66, %cst_28 [0] : vector<8x1xf32> to vector<1xf32>
    %68 = vector.shape_cast %67 : vector<1xf32> to vector<1x1xf32>
    %cst_29 = arith.constant 1.250000e-01 : f32
    %69 = vector.broadcast %cst_29 : f32 to vector<1x1xf32>
    %70 = arith.mulf %68, %69 : vector<1x1xf32>
    %71 = tpu.iota {dimensions = array<i32: 1>} : vector<8x4xi32>
    %c0_i32 = arith.constant 0 : i32
    %72 = vector.broadcast %c0_i32 : i32 to vector<8x4xi32>
    %73 = arith.cmpi eq, %71, %72 : vector<8x4xi32>
    %c1_i32 = arith.constant 1 : i32
    %74 = vector.broadcast %c1_i32 : i32 to vector<8x4xi32>
    %75 = arith.cmpi eq, %71, %74 : vector<8x4xi32>
    %c2_i32 = arith.constant 2 : i32
    %76 = vector.broadcast %c2_i32 : i32 to vector<8x4xi32>
    %77 = arith.cmpi eq, %71, %76 : vector<8x4xi32>
    %78 = vector.shape_cast %31 : vector<1x1xf32> to vector<1x1xf32>
    %79 = vector.broadcast %78 : vector<1x1xf32> to vector<8x4xf32>
    %80 = vector.shape_cast %70 : vector<1x1xf32> to vector<1x1xf32>
    %81 = vector.broadcast %80 : vector<1x1xf32> to vector<8x4xf32>
    %82 = arith.select %77, %79, %81 : vector<8x4xi1>, vector<8x4xf32>
    %83 = vector.shape_cast %65 : vector<8x1xf32> to vector<8x1xf32>
    %84 = vector.broadcast %83 : vector<8x1xf32> to vector<8x4xf32>
    %85 = arith.select %75, %84, %82 : vector<8x4xi1>, vector<8x4xf32>
    %86 = vector.shape_cast %26 : vector<8x1xf32> to vector<8x1xf32>
    %87 = vector.broadcast %86 : vector<8x1xf32> to vector<8x4xf32>
    %88 = arith.select %73, %87, %85 : vector<8x4xi1>, vector<8x4xf32>
    %c0_30 = arith.constant 0 : index
    %c0_31 = arith.constant 0 : index
    %89 = vector.load %arg6[%c0_30, %c0_31] : memref<8x4xf32, #tpu.memory_space<vmem>>, vector<8x4xf32>
    tpu.vector_store %arg6[%c0_30, %c0_31], %88 {strides = array<i32>} : memref<8x4xf32, #tpu.memory_space<vmem>>, vector<8x4xf32>,
    return
  }
}

</mosaic_0001>

<bundles_post_ra>
// kernel: meta_task_weighting.1
= control target key start
LH: loop header
LB: loop body
LE: loop exit
PB: predicated region body
PF: predicated region fallthrough
CT: control target
= control target key end

     0   :  { %v187_v0 = vlaneseq  ;;  %v459_v4 = vmov 0.0|0.0   ;;  %vm460_vm0 = vmmov 0   ;;  %v461_v5 = vmov 0.0   ;;  %s649_s3 = inlined_call_operand.vmem [shape: f32[256,32], index: 3, kind: input, shape index: {}]   ;;  %s650_s1 = inlined_call_operand.vmem [shape: f32[1,256], index: 1, kind: input, shape index: {}]   ;;  %s651_s2 = inlined_call_operand.vmem [shape: f32[32,128], index: 2, kind: input, shape index: {}]   ;;  %s652_s0 = inlined_call_operand.vmem [shape: f32[8,32], index: 0, kind: input, shape index: {}]   ;;  %s653_s4 = inlined_call_operand.vmem [shape: f32[4,128], index: 4, kind: input, shape index: {}]   ;;  %s654_s5 = inlined_call_operand.vmem [shape: f32[8,1], index: 5, kind: input, shape index: {}]   ;;  %s655_s6 = inlined_call_operand.vmem [shape: f32[8,4], index: 6, kind: output, shape index: {}]  }
   0x1   :  { %v170_v1 = vld [vmem:[%s649_s3 + $0x80] sm:$0xff]  ;;  %v171_v2 = vld [vmem:[%s649_s3 + $0x88] sm:$0xff]  ;;  %401 = vmatprep.subr.bf16.mxu0 %v459_v4  ;;  %398 = vmatprep.mubr.msk.f32.mxu0 %vm460_vm0, %v461_v5  ;;  %v172_v8 = vld [vmem:[%s649_s3 + $0x90] sm:$0xff]  ;;  %vm37_vm1 = vcmask 261120   ;;  %vm269_vm2 = vcmask 253952   ;;  %vm124_vm3 = vcmask 7168  }
   0x2   :  { %v154_v3 = vld [vmem:[%s649_s3] sm:$0xff]  ;;  %v407_v6 = vpack.c.bf16 %v171_v2, %v170_v1  ;;  %v155_v7 = vld [vmem:[%s649_s3 + $0x8] sm:$0xff]  ;;  %v173_v9 = vld [vmem:[%s649_s3 + $0x98] sm:$0xff]  ;;  %v529_v16 = vshrl.u32 %v187_v0, 7  ;;  %vm340_vm7 = vcmask 31744  }
   0x3   :  { %v409_v10 = vpack.c.bf16 %v155_v7, %v154_v3  ;;  %v411_v11 = vpack.c.bf16 %v173_v9, %v172_v8  ;;  %v156_v12 = vld [vmem:[%s649_s3 + $0x10] sm:$0xff]  ;;  %v157_v13 = vld [vmem:[%s649_s3 + $0x18] sm:$0xff]  ;;  %v174_v14 = vld [vmem:[%s649_s3 + $0xa0] sm:$0xff] }
   0x4   :  { %408 = vmatprep.subr.bf16.mxu1 %v407_v6  ;;  %v175_v15 = vld [vmem:[%s649_s3 + $0xa8] sm:$0xff]  ;;  %v413_v17 = vpack.c.bf16 %v157_v13, %v156_v12  ;;  %v158_v19 = vld [vmem:[%s649_s3 + $0x20] sm:$0xff]  ;;  %v176_v21 = vld [vmem:[%s649_s3 + $0xb0] sm:$0xff]  ;;  %v193_v23 = vsub.s32 1, %v529_v16  ;;  %v189_v61 = vsub.s32 0, %v529_v16 }
   0x5   :  { %410 = vmatpush3.bf16.msra.mxu1 %v409_v10  ;;  %v415_v18 = vpack.c.bf16 %v175_v15, %v174_v14  ;;  %v159_v20 = vld [vmem:[%s649_s3 + $0x28] sm:$0xff]  ;;  %v177_v22 = vld [vmem:[%s649_s3 + $0xb8] sm:$0xff]  ;;  %v160_v26 = vld [vmem:[%s649_s3 + $0x30] sm:$0xff] }
   0x6   :  { %412 = vmatprep.subr.bf16.mxu1 %v411_v11  ;;  %v417_v24 = vpack.c.bf16 %v159_v20, %v158_v19  ;;  %v419_v25 = vpack.c.bf16 %v177_v22, %v176_v21  ;;  %v161_v27 = vld [vmem:[%s649_s3 + $0x38] sm:$0xff]  ;;  %v178_v28 = vld [vmem:[%s649_s3 + $0xc0] sm:$0xff]  ;;  %v179_v29 = vld [vmem:[%s649_s3 + $0xc8] sm:$0xff] }
   0x7   :  { %v153_v30 = vld [vmem:[%s650_s1] sm:$0x3]  ;;  %v30_v33 = vld [vmem:[%s651_s2 + $0x8] sm:$0xff]  ;;  %v31_v34 = vld [vmem:[%s651_s2 + $0x10] sm:$0xff]  ;;  %v421_v35 = vpack.c.bf16 %v161_v27, %v160_v26  ;;  %v423_v38 = vpack.c.bf16 %v179_v29, %v178_v28 }
   0x8   :  { %v194_v31 = vrot.slane %v153_v30, %v193_v23  ;;  %v29_v32 = vld [vmem:[%s651_s2] sm:$0xff]  ;;  %v32_v37 = vld [vmem:[%s651_s2 + $0x18] sm:$0xff]  ;;  %v163_v40 = vld [vmem:[%s649_s3 + $0x48] sm:$0xff]  ;;  %v190_v63 = vrot.slane %v153_v30, %v189_v61 }
   0x9   :  { %414 = vmatpush3.bf16.msra.mxu1 %v413_v17  ;;  %v402_v36 = vpack.c.bf16 %v30_v33, %v29_v32  ;;  %v162_v39 = vld [vmem:[%s649_s3 + $0x40] sm:$0xff]  ;;  %v180_v41 = vld [vmem:[%s649_s3 + $0xd0] sm:$0xff]  ;;  %v181_v42 = vld [vmem:[%s649_s3 + $0xd8] sm:$0xff]  ;;  %v405_v43 = vpack.c.bf16 %v32_v37, %v31_v34 }
   0xa   :  { %416 = vmatprep.subr.bf16.mxu1 %v415_v18  ;;  %261 = vmatprep.mubr.f32.mxu1 %v194_v31  ;;  %v425_v44 = vpack.c.bf16 %v163_v40, %v162_v39  ;;  %v427_v45 = vpack.c.bf16 %v181_v42, %v180_v41  ;;  %v164_v46 = vld [vmem:[%s649_s3 + $0x50] sm:$0xff]  ;;  %v165_v47 = vld [vmem:[%s649_s3 + $0x58] sm:$0xff]  ;;  %v182_v48 = vld [vmem:[%s649_s3 + $0xe0] sm:$0xff] }
   0xb   :  { %403 = vmatpush3.bf16.msra.mxu0 %v402_v36  ;;  %v183_v49 = vld [vmem:[%s649_s3 + $0xe8] sm:$0xff]  ;;  %v598_v50 = vld [vmem:[%s652_s0] sm:$0xff]  ;;  %v429_v51 = vpack.c.bf16 %v165_v47, %v164_v46  ;;  %v184_v55 = vld [vmem:[%s649_s3 + $0xf0] sm:$0xff] }
   0xc   :  { %404 = vmatprep.subr.bf16.mxu0 %v459_v4  ;;  %v431_v52 = vpack.c.bf16 %v183_v49, %v182_v48  ;;  %v166_v53 = vld [vmem:[%s649_s3 + $0x60] sm:$0xff]  ;;  %v167_v54 = vld [vmem:[%s649_s3 + $0x68] sm:$0xff]  ;;  %v185_v56 = vld [vmem:[%s649_s3 + $0xf8] sm:$0xff]  ;;  %v276_v15 = vmul.f32 %v598_v50, %v598_v50 }
   0xd   :  { %418 = vmatpush3.bf16.msra.mxu1 %v417_v24  ;;  %v433_v57 = vpack.c.bf16 %v167_v54, %v166_v53  ;;  %v435_v58 = vpack.c.bf16 %v185_v56, %v184_v55  ;;  %v168_v59 = vld [vmem:[%s649_s3 + $0x70] sm:$0xff]  ;;  %v169_v60 = vld [vmem:[%s649_s3 + $0x78] sm:$0xff]  ;;  %v346_v1 = vld [vmem:[%s653_s4] ss:$0 sm:$0xff] }
   0xe   :  { %420 = vmatprep.subr.bf16.mxu1 %v419_v25  ;;  %v437_v62 = vpack.c.bf16 %v169_v60, %v168_v59  ;;  %v348_v5 = vld [vmem:[%s653_s4 + $0x1] ss:$0 sm:$0xff]  ;;  %v28_v9 = vld [vmem:[%s653_s4 + $0x3] sm:$0x1]  ;;  %v277_v17 = vsel %vm37_vm1, %v276_v15, 0.0 }
   0xf   :  { %406 = vmatpush3.bf16.msra.mxu0 %v405_v43  ;;  %v349_v18 = vld [vmem:[%s653_s4 + $0x2] ss:$0 sm:$0xff] }
  0x11   :  { %422 = vmatpush3.bf16.msra.mxu1 %v421_v35 }
  0x12   :  { %424 = vmatprep.subr.bf16.mxu1 %v423_v38  ;;  %399 = vmatmul.mubr.msk.f32.vlgmr.msra.gmra.mrb[0].mxu0 %vm37_vm1, %v598_v50 }
  0x15   :  { %426 = vmatpush3.bf16.msra.mxu1 %v425_v44 }
  0x16   :  { %428 = vmatprep.subr.bf16.mxu1 %v427_v45 }
  0x19   :  { %430 = vmatpush3.bf16.msra.mxu1 %v429_v51 }
  0x1a   :  { %432 = vmatprep.subr.bf16.mxu1 %v431_v52  ;;  %v24_v52 = vld [vmem:[%s654_s5] sm:$0xff] }
  0x1d   :  { %434 = vmatpush3.bf16.msra.mxu1 %v433_v57 }
  0x1e   :  { %436 = vmatprep.subr.bf16.mxu1 %v435_v58 }
  0x21   :  { %438 = vmatpush3.bf16.msra.mxu1 %v437_v62 }
  0x24   :  { %262 = vmatmul.mubr.f32.vlgmr.msra.gmra.mrb[0].mxu1 %v190_v63 }
  0xe5   :  { %v107_v2 = vpop.f32.mrb[0].mxu0 }
  0xe6   :  { %v108_v3 = vadd.f32 %v346_v1, %v107_v2  ;;  %v400_v4 = vpop.f32.mrb[1].mxu0 }
  0xe8   :  { %v111_v6 = vmax.f32 %v108_v3, 0.0 }
  0xea   :  { %v116_v7 = vmul.f32 %v348_v5, %v111_v6 }
  0xec   :  { %117 = vadd.xlane.f32.xlu1 %v116_v7 }
  0xf7   :  { %v387_v8 = vpop.f32.mrb[0].mxu1 }
  0xf8   :  { %v388_v10 = vpop.f32.mrb[1].mxu1 }
  0xf9   :  { %v389_v11 = vadd.f32 %v388_v10, %v387_v8 }
  0xfb   :  { %v264_v12 = vadd.f32 %v389_v11, %v28_v9 }
  0xfd   :  { %445 = vtanh.f32 %v264_v12 }
 0x107   :  { %v446_v13 = vpop.eup %445 }
 0x108   :  { %v268_v14 = vmul.f32 %v446_v13, %v446_v13 }
 0x10a   :  { %v270_v16 = vsel %vm269_vm2, %v268_v14, 0.0 }
 0x10b   :  { %271 = vadd.xlane.f32.xlu0 %v270_v16 }
 0x10f   :  { %278 = vadd.xlane.f32.xlu0 %v277_v17 }
 0x179   :  { %v118_v19 = vpop.xlane.xlu1 %117 }
 0x17a   :  { %v123_v20 = vadd.f32 %v349_v18, %v118_v19 }
 0x17c   :  { %v125_v21 = vsel %vm124_vm3, %v123_v20, -inf }
 0x17d   :  { %v126_v22 = vrot.slane %v125_v21, 4 }
 0x17f   :  { %v127_v23 = vmax.f32 %v125_v21, %v126_v22 }
 0x181   :  { %v128_v24 = vrot.slane %v127_v23, 2 }
 0x183   :  { %v129_v25 = vmax.f32 %v127_v23, %v128_v24 }
 0x185   :  { %v130_v26 = vrot.slane %v129_v25, 1 }
 0x187   :  { %v131_v27 = vmax.f32 %v129_v25, %v130_v26  ;;  %v318_v26 = vand.u32 127, %v187_v0 }
 0x189   :  { %v132_v28 = vsub.f32 %v123_v20, %v131_v27  ;;  %vm321_vm4 = vcmp.eq.s32.totalorder %v318_v26, 2  ;;  %vm320_vm5 = vcmp.eq.s32.totalorder %v318_v26, 1  ;;  %vm319_vm6 = vcmp.eq.s32.totalorder %v318_v26, 0 }
 0x18b   :  { %v133_v29 = vmul.f32 1.442695, %v132_v28 }
 0x18d   :  { %447 = vpow2.f32 %v133_v29 }
 0x197   :  { %v448_v32 = vpop.eup %447 }
 0x198   :  { %v272_v30 = vpop.xlane.xlu0 %271  ;;  %v135_v34 = vsel %vm124_vm3, %v448_v32, 0.0 }
 0x199   :  { %v273_v31 = vmax.f32 %v272_v30, 1e-24  ;;  %v136_v36 = vrot.slane %v135_v34, 4 }
 0x19b   :  { %449 = vrsqrt.f32 %v273_v31  ;;  %v137_v37 = vadd.f32 %v136_v36, %v135_v34 }
 0x19c   :  { %v279_v33 = vpop.xlane.xlu0 %278 }
 0x19d   :  { %v280_v35 = vmax.f32 %v279_v33, 1e-24  ;;  %v138_v40 = vrot.slane %v137_v37, 2 }
 0x19f   :  { %451 = vrsqrt.f32 %v280_v35  ;;  %v139_v44 = vadd.f32 %v138_v40, %v137_v37 }
 0x1a1   :  { %v140_v47 = vrot.slane %v139_v44, 1 }
 0x1a3   :  { %v141_v48 = vadd.f32 %v140_v47, %v139_v44 }
 0x1a5   :  { %v450_v38 = vpop.eup %449  ;;  %453 = vrcp.f32 %v141_v48 }
 0x1a6   :  { %v275_v39 = vmul.f32 %v450_v38, %v446_v13 }
 0x1a8   :  { %v286_v43 = vrot.slane %v275_v39, %v189_v61  ;;  %v462_v61 = vmov 0  }
 0x1a9   :  { %v452_v41 = vpop.eup %451  ;;  %443 = vset.pattern.permute.xlu0 %v462_v61  ;;  %444 = vset.pattern.permute.xlu1 %v462_v61 }
 0x1aa   :  { %v282_v42 = vmul.f32 %v452_v41, %v598_v50 }
 0x1ac   :  { %v287_v45 = vmul.f32 %v286_v43, %v282_v42 }
 0x1ae   :  { %v288_v46 = vsel %vm37_vm1, %v287_v45, 0.0 }
 0x1af   :  { %289 = vadd.xlane.f32.xlu1 %v288_v46  ;;  %v454_v49 = vpop.eup %453 }
 0x1b0   :  { %v143_v51 = vmul.f32 %v454_v49, %v448_v32 }
 0x1b2   :  { %v144_v53 = vmul.f32 %v143_v51, %v24_v52 }
 0x1b4   :  { %v145_v54 = vsel %vm124_vm3, %v144_v53, 0.0 }
 0x1b5   :  { %v146_v55 = vrot.slane %v145_v54, 4 }
 0x1b7   :  { %v147_v50 = vadd.f32 %v146_v55, %v145_v54 }
 0x1b9   :  { %v148_v56 = vrot.slane %v147_v50, 2 }
 0x1bb   :  { %v149_v57 = vadd.f32 %v148_v56, %v147_v50 }
 0x1bd   :  { %v150_v58 = vrot.slane %v149_v57, 1 }
 0x1bf   :  { %v151_v59 = vadd.f32 %v150_v58, %v149_v57 }
 0x1c1   :  { %v152_v60 = vmul.f32 0.125, %v151_v59 }
 0x1c3   :  { %324 = vperm.xlu0 %443, %v152_v60  }
 0x23c   :  { %v290_v62 = vpop.xlane.xlu1 %289 }
 0x23d   :  { %v291_v63 = vrot.slane %v290_v62, 4 }
 0x23f   :  { %v292_v1 = vmax.f32 %v290_v62, %v291_v63 }
 0x241   :  { %v293_v2 = vrot.slane %v292_v1, 2 }
 0x242   :  { %v325_v27 = vpop.permute.xlu0 %324 }
 0x243   :  { %v294_v3 = vmax.f32 %v292_v1, %v293_v2 }
 0x245   :  { %v295_v4 = vrot.slane %v294_v3, 1 }
 0x247   :  { %v296_v5 = vmax.f32 %v294_v3, %v295_v4 }
 0x249   :  { %v297_v6 = vsub.f32 %v290_v62, %v296_v5 }
 0x24b   :  { %v298_v7 = vmul.f32 1.442695, %v297_v6 }
 0x24d   :  { %455 = vpow2.f32 %v298_v7 }
 0x257   :  { %v456_v8 = vpop.eup %455 }
 0x258   :  { %v300_v9 = vrot.slane %v456_v8, 4 }
 0x25a   :  { %v301_v10 = vadd.f32 %v456_v8, %v300_v9 }
 0x25c   :  { %v302_v11 = vrot.slane %v301_v10, 2 }
 0x25e   :  { %v303_v12 = vadd.f32 %v302_v11, %v301_v10 }
 0x260   :  { %v304_v13 = vrot.slane %v303_v12, 1 }
 0x262   :  { %v305_v14 = vadd.f32 %v304_v13, %v303_v12 }
 0x264   :  { %457 = vrcp.f32 %v305_v14 }
 0x26e   :  { %v458_v15 = vpop.eup %457 }
 0x26f   :  { %v307_v16 = vmul.f32 %v458_v15, %v456_v8 }
 0x271   :  { %v308_v17 = vmul.f32 %v307_v16, %v24_v52 }
 0x273   :  { %v309_v18 = vsel %vm124_vm3, %v308_v17, 0.0 }
 0x274   :  { %v310_v19 = vrot.slane %v309_v18, 4 }
 0x276   :  { %v311_v20 = vadd.f32 %v310_v19, %v309_v18 }
 0x278   :  { %v312_v21 = vrot.slane %v311_v20, 2 }
 0x27a   :  { %v313_v22 = vadd.f32 %v312_v21, %v311_v20 }
 0x27c   :  { %v314_v23 = vrot.slane %v313_v22, 1 }
 0x27e   :  { %v315_v24 = vadd.f32 %v314_v23, %v313_v22 }
 0x280   :  { %v316_v25 = vmul.f32 0.125, %v315_v24 }
 0x282   :  { %329 = vperm.xlu1 %444, %v316_v25  }
 0x286   :  { %336 = vperm.xlu1 %444, %v143_v51  }
 0x301   :  { %v330_v28 = vpop.permute.xlu1 %329 }
 0x302   :  { %v332_v29 = vsel %vm321_vm4, %v325_v27, %v330_v28 }
 0x303   :  { %v333_v30 = vsel %vm320_vm5, %v307_v16, %v332_v29 }
 0x305   :  { %v337_v31 = vpop.permute.xlu1 %336 }
 0x306   :  { %v339_v32 = vsel %vm319_vm6, %v337_v31, %v333_v30 }
 0x307   :  { %341 = vst.msk [vmem:[%s655_s6] sm:$0xff] %vm340_vm7, %v339_v32 }

</bundles_post_ra>
